<compile_context>
chip_gen: v5e
topology: v5e:2x2
jax: 0.10.0
libtpu: 0.0.40
codegen_flags: <defaults>
</compile_context>

<pallas_src>
import functools

import jax
import jax.numpy as jnp
from jax.experimental import pallas as pl
from jax.experimental.pallas import tpu as pltpu


def _round_up(v, m):
    return (v + m - 1) // m * m


def _cnn_encoder_kernel(x_ref, w_ref, b_ref, out_ref, *, kernel_num):
    """relu(conv_k(x)) -> max over valid positions, for k in (2, 3, 4), fused.

    x_ref:   (TB, S, E)  f32  -- cast to bf16 in-kernel (VPU, hidden under DMA)
    w_ref:   (E, NP)     bf16 -- cols: [w2_r0|w2_r1|w3_r0..2|w4_r0..3|zero pad]
    b_ref:   (1, NP)     f32  -- bias of conv k sits only in its i==0 block
    out_ref: (TB, OUT_P) f32  -- [r2|r3|r4|zero pad], lane-dense
    """
    C = kernel_num
    TB, S, E = x_ref.shape
    NP = w_ref.shape[1]
    OUT_P = out_ref.shape[1]

    # Single MXU call for all convs / kernel rows: (TB*S, E) @ (E, NP).
    # Reshape while still f32 (sublane pack 8), then cast to bf16 on the VPU.
    x = x_ref[...].reshape(TB * S, E).astype(jnp.bfloat16)
    y = jnp.dot(x, w_ref[...], preferred_element_type=jnp.float32)
    y = y.reshape(TB, S, NP) + b_ref[...]          # one hoisted bias broadcast

    # Shifted-add epilogue per conv (MXU is done; this is VPU/XLU filler).
    # conv_k[b, t, c] = sum_{i<k} y[b, t+i, block(k, i), c]
    results = []
    col = 0
    for k in (2, 3, 4):
        L = S - k + 1
        acc = y[:, 0:L, col:col + C]
        for i in range(1, k):
            acc = acc + y[:, i:i + L, col + i * C:col + (i + 1) * C]
        col += k * C
        acc = jnp.maximum(acc, 0.0)                # ReLU (f32 epilogue)
        results.append(jnp.max(acc, axis=1))       # max_pool1d over length -> (TB, C)

    res = jnp.concatenate(results, axis=1)         # (TB, 3C)
    if OUT_P > 3 * C:                              # pad so the store is lane-dense
        res = jnp.concatenate(
            [res, jnp.zeros((TB, OUT_P - 3 * C), jnp.float32)], axis=1)
    out_ref[...] = res                             # single unmasked (TB, OUT_P) store


def _vmem_capacity_bytes():
    """Per-TensorCore VMEM capacity; conservative (v7x) fallback."""
    try:
        info = pltpu.get_tpu_info()
        cap = getattr(info, "vmem_capacity_bytes", None)
        if cap:
            return int(cap)
    except Exception:
        pass
    return 64 * 1024 * 1024


def _pick_batch_tile(B, S, E, NP, OUT_P, tile_budget):
    """Largest batch tile whose lane/sublane-PADDED footprint fits the budget.

    Counts: double-buffered f32 x tile, the in-kernel bf16 copy of x, the f32
    matmul result y with ~3x headroom for the (unaligned) epilogue slice
    copies, and the double-buffered output block."""
    E_pad = _round_up(E, 128)     # lane padding of the embedding dim
    S8 = _round_up(S, 8)          # f32 sublane pack
    S16 = _round_up(S, 16)        # bf16 sublane pack
    per_row = (
        2 * S8 * E_pad * 4        # double-buffered f32 x block
        + S16 * E_pad * 2         # in-kernel bf16 copy of the x tile
        + 3 * S8 * NP * 4         # f32 y + headroom for epilogue slice copies
        + 2 * OUT_P * 4           # double-buffered output block
    )
    tb = max(8, tile_budget // per_row)
    return max(8, (tb // 8) * 8)  # sublane-aligned


def cnn_encoder_forward(x, w2, b2, w3, b3, w4, b4, *, batch_tile=None):
    """x: (B, S, E) f32.  Returns (B, 3*kernel_num) f32 (dropout = identity)."""
    B, S, E = x.shape
    C = w2.shape[0]
    assert S >= 4, "seq_len must be >= the largest conv kernel height (4)"

    # --- fuse + pre-transpose weights in the wrapper (free at trace time) ---
    w_cols, b_cols = [], []
    for w, b, k in ((w2, b2, 2), (w3, b3, 3), (w4, b4, 4)):
        for i in range(k):
            w_cols.append(jnp.transpose(w[:, i, :]))               # (E, C)
            b_cols.append(b.reshape(-1) if i == 0
                          else jnp.zeros((C,), jnp.float32))
    w_all = jnp.concatenate(w_cols, axis=1)                        # (E, 9C)
    b_all = jnp.concatenate(b_cols)                                # (9C,)
    NP = _round_up(9 * C, 128)
    if NP > 9 * C:
        w_all = jnp.pad(w_all, ((0, 0), (0, NP - 9 * C)))
        b_all = jnp.pad(b_all, (0, NP - 9 * C))
    w_all = w_all.astype(jnp.bfloat16)
    b_all = b_all.reshape(1, NP).astype(jnp.float32)
    OUT_P = _round_up(3 * C, 128)

    # --- generation-gated VMEM budget (v5e/v6e: 128 MiB/TC, v7x: 64 MiB/TC) ---
    cap = _vmem_capacity_bytes()
    if cap >= (96 << 20):
        vmem_limit = 96 << 20               # v5e / v6e: use most of 128 MiB
    else:
        vmem_limit = min(40 << 20, int(cap * 0.625))   # v7x: leave headroom
    # Fixed (batch-independent) residents: double-buffered weights + bias,
    # plus a small safety margin.  (Could be halved with pl.Buffered(1) on the
    # constant-index weight/bias specs; kept default-buffered for portability.)
    fixed = 2 * (_round_up(E, 16) * NP * 2) + 2 * (8 * NP * 4) + (2 << 20)
    tile_budget = max(1 << 20, int((vmem_limit - fixed) * 0.8))

    # --- batch tiling: biggest tile that fits, but never a 1-step grid when
    #     B is large enough (v7x dual-TC sharding + DMA/compute overlap) ---
    if batch_tile is not None:
        TB = max(1, min(batch_tile, B))
    elif B <= 8:
        TB = B                              # tiny batch: single full block
    else:
        TB = _pick_batch_tile(B, S, E, NP, OUT_P, tile_budget)
        min_steps = 4 if B >= 32 else 2     # enforce grid depth when possible
        depth_cap = _round_up(-(-B // min_steps), 8)
        TB = min(TB, depth_cap)
        TB = max(8, (TB // 8) * 8)

    B_pad = _round_up(B, TB)
    if B_pad > B:                           # sub-tile remainder only; no dtype cast
        x = jnp.pad(x, ((0, B_pad - B), (0, 0), (0, 0)))

    kernel = functools.partial(_cnn_encoder_kernel, kernel_num=C)
    out = pl.pallas_call(
        kernel,
        out_shape=jax.ShapeDtypeStruct((B_pad, OUT_P), jnp.float32),
        grid_spec=pltpu.PrefetchScalarGridSpec(
            num_scalar_prefetch=0,
            grid=(B_pad // TB,),
            in_specs=[
                pl.BlockSpec((TB, S, E), lambda b: (b, 0, 0)),     # batch-tiled f32 x
                pl.BlockSpec((E, NP), lambda b: (0, 0)),           # resident weights
                pl.BlockSpec((1, NP), lambda b: (0, 0)),           # resident bias
            ],
            out_specs=pl.BlockSpec((TB, OUT_P), lambda b: (b, 0)),
        ),
        compiler_params=pltpu.CompilerParams(
            dimension_semantics=("parallel",),
            vmem_limit_bytes=vmem_limit,
        ),
    )(x, w_all, b_all)
    return out[:B, :3 * C]


def init_params(key, embedding_dim, kernel_num):
    """Deterministic synthetic Conv2d(1, kernel_num, (k, embedding_dim)) params."""
    params = {}
    for k in (2, 3, 4):
        key, kw, kb = jax.random.split(key, 3)
        fan_in = 1 * k * embedding_dim
        bound = 1.0 / jnp.sqrt(fan_in)
        # Conv2d weight (C_out, 1, k, E) -> squeeze in-channel axis -> (C_out, k, E)
        params[f"w{k}"] = jax.random.uniform(
            kw, (kernel_num, k, embedding_dim), jnp.float32, -bound, bound)
        params[f"b{k}"] = jax.random.uniform(
            kb, (1, kernel_num), jnp.float32, -bound, bound)
    return params


def reference_forward(x, p):
    """Pure-JAX reference of the PyTorch forward (eval-mode dropout).

    Uses the same bf16-operand / f32-accumulate matmul as the kernel so the
    comparison checks kernel structure, not bf16 rounding."""
    B, S, E = x.shape
    xb = x.astype(jnp.bfloat16)
    outs = []
    for k in (2, 3, 4):
        w, b = p[f"w{k}"], p[f"b{k}"]
        wb = w.astype(jnp.bfloat16)
        L = S - k + 1
        acc = jnp.zeros((B, L, w.shape[0]), jnp.float32)
        for i in range(k):
            acc = acc + jnp.einsum("ble,ce->blc", xb[:, i:i + L, :], wb[:, i, :],
                                   preferred_element_type=jnp.float32)
        acc = jnp.maximum(acc + b.reshape(1, 1, -1), 0.0)
        outs.append(jnp.max(acc, axis=1))
    return jnp.concatenate(outs, axis=1)


if __name__ == "__main__":
    key = jax.random.PRNGKey(0)
    B, S, E, C = 2, 8, 16, 8          # batch, seq_len, embedding_dim, kernel_num

    key, kx = jax.random.split(key)
    x = jax.random.normal(kx, (B, S, E), jnp.float32)
    p = init_params(key, E, C)

    # 1) tiny batch, single-block path
    out = cnn_encoder_forward(x, p["w2"], p["b2"], p["w3"], p["b3"],
                              p["w4"], p["b4"])
    out = jax.block_until_ready(out)
    ref = reference_forward(x, p)
    assert out.shape == (B, 3 * C), out.shape
    assert jnp.allclose(out, ref, atol=1e-2, rtol=1e-2), \
        f"max err {jnp.max(jnp.abs(out - ref))}"

    # 2) explicit batch tile (exercises multi-step tiling + pipelining path)
    B2 = 24
    key, kx2 = jax.random.split(key)
    x2 = jax.random.normal(kx2, (B2, S, E), jnp.float32)
    out2 = cnn_encoder_forward(x2, p["w2"], p["b2"], p["w3"], p["b3"],
                               p["w4"], p["b4"], batch_tile=8)
    out2 = jax.block_until_ready(out2)
    ref2 = reference_forward(x2, p)
    assert out2.shape == (B2, 3 * C), out2.shape
    assert jnp.allclose(out2, ref2, atol=1e-2, rtol=1e-2), \
        f"max err {jnp.max(jnp.abs(out2 - ref2))}"

    # 3) auto tile selection (exercises VMEM-budget + min-grid-depth logic)
    B3 = 64
    key, kx3 = jax.random.split(key)
    x3 = jax.random.normal(kx3, (B3, S, E), jnp.float32)
    out3 = cnn_encoder_forward(x3, p["w2"], p["b2"], p["w3"], p["b3"],
                               p["w4"], p["b4"])
    out3 = jax.block_until_ready(out3)
    ref3 = reference_forward(x3, p)
    assert out3.shape == (B3, 3 * C), out3.shape
    assert jnp.allclose(out3, ref3, atol=1e-2, rtol=1e-2), \
        f"max err {jnp.max(jnp.abs(out3 - ref3))}"

    print("KERNEL_OK")
</pallas_src>

<mosaic_0001>
module attributes {stable_mosaic.version = 11 : i64} {
  func.func @_cnn_encoder_kernel(%arg0: i32, %arg1: memref<2x8x16xf32, #tpu.memory_space<vmem>>, %arg2: memref<16x128xbf16, #tpu.memory_space<vmem>>, %arg3: memref<1x128xf32, #tpu.memory_space<vmem>>, %arg4: memref<2x128xf32, #tpu.memory_space<vmem>>) attributes {dimension_semantics = [#tpu.dimension_semantics<parallel>], iteration_bounds = array<i64: 1>, scalar_prefetch = 0 : i64, scratch_operands = 0 : i64, tpu.core_type = #tpu.core_type<tc>, window_params = [{transform_indices = @transform_0, window_bounds = array<i64: 2, 8, 16>}, {pipeline_mode = #tpu.pipeline_mode<synchronous>, transform_indices = @transform_1, window_bounds = array<i64: 16, 128>}, {pipeline_mode = #tpu.pipeline_mode<synchronous>, transform_indices = @transform_2, window_bounds = array<i64: 1, 128>}, {transform_indices = @transform_3, window_bounds = array<i64: 2, 128>}]} {
    %c0 = arith.constant 0 : index
    %c0_0 = arith.constant 0 : index
    %c0_1 = arith.constant 0 : index
    %0 = vector.load %arg1[%c0, %c0_0, %c0_1] : memref<2x8x16xf32, #tpu.memory_space<vmem>>, vector<2x8x16xf32>
    %1 = vector.shape_cast %0 : vector<2x8x16xf32> to vector<16x16xf32>
    %2 = arith.truncf %1 : vector<16x16xf32> to vector<16x16xbf16>
    %c0_2 = arith.constant 0 : index
    %c0_3 = arith.constant 0 : index
    %3 = vector.load %arg2[%c0_2, %c0_3] : memref<16x128xbf16, #tpu.memory_space<vmem>>, vector<16x128xbf16>
    %cst = arith.constant dense<0.000000e+00> : vector<16x128xf32>
    %4 = tpu.matmul %2, %3, %cst {dimension_numbers = #tpu.dot_dimension_numbers<[1], [0], [0], [1], [0, 0, 1, 1], [], []>} : vector<16x16xbf16>, vector<16x128xbf16>, vector<16x128xf32> -> vector<16x128xf32>
    %5 = vector.shape_cast %4 : vector<16x128xf32> to vector<2x8x128xf32>
    %c0_4 = arith.constant 0 : index
    %c0_5 = arith.constant 0 : index
    %6 = vector.load %arg3[%c0_4, %c0_5] : memref<1x128xf32, #tpu.memory_space<vmem>>, vector<1x128xf32>
    %7 = vector.shape_cast %6 : vector<1x128xf32> to vector<1x1x128xf32>
    %8 = vector.broadcast %7 : vector<1x1x128xf32> to vector<2x8x128xf32>
    %9 = arith.addf %5, %8 : vector<2x8x128xf32>
    %10 = vector.extract_strided_slice %9 {offsets = [0, 0, 0], sizes = [2, 7, 8], strides = [1, 1, 1]} : vector<2x8x128xf32> to vector<2x7x8xf32>
    %11 = vector.extract_strided_slice %9 {offsets = [0, 1, 8], sizes = [2, 7, 8], strides = [1, 1, 1]} : vector<2x8x128xf32> to vector<2x7x8xf32>
    %12 = arith.addf %10, %11 : vector<2x7x8xf32>
    %cst_6 = arith.constant 0.000000e+00 : f32
    %13 = vector.broadcast %cst_6 : f32 to vector<2x7x8xf32>
    %14 = arith.maximumf %12, %13 : vector<2x7x8xf32>
    %cst_7 = arith.constant dense<0xFF800000> : vector<2x8xf32>
    %15 = vector.multi_reduction <maximumf>, %14, %cst_7 [1] : vector<2x7x8xf32> to vector<2x8xf32>
    %16 = vector.extract_strided_slice %9 {offsets = [0, 0, 16], sizes = [2, 6, 8], strides = [1, 1, 1]} : vector<2x8x128xf32> to vector<2x6x8xf32>
    %17 = vector.extract_strided_slice %9 {offsets = [0, 1, 24], sizes = [2, 6, 8], strides = [1, 1, 1]} : vector<2x8x128xf32> to vector<2x6x8xf32>
    %18 = arith.addf %16, %17 : vector<2x6x8xf32>
    %19 = vector.extract_strided_slice %9 {offsets = [0, 2, 32], sizes = [2, 6, 8], strides = [1, 1, 1]} : vector<2x8x128xf32> to vector<2x6x8xf32>
    %20 = arith.addf %18, %19 : vector<2x6x8xf32>
    %cst_8 = arith.constant 0.000000e+00 : f32
    %21 = vector.broadcast %cst_8 : f32 to vector<2x6x8xf32>
    %22 = arith.maximumf %20, %21 : vector<2x6x8xf32>
    %cst_9 = arith.constant dense<0xFF800000> : vector<2x8xf32>
    %23 = vector.multi_reduction <maximumf>, %22, %cst_9 [1] : vector<2x6x8xf32> to vector<2x8xf32>
    %24 = vector.extract_strided_slice %9 {offsets = [0, 0, 40], sizes = [2, 5, 8], strides = [1, 1, 1]} : vector<2x8x128xf32> to vector<2x5x8xf32>
    %25 = vector.extract_strided_slice %9 {offsets = [0, 1, 48], sizes = [2, 5, 8], strides = [1, 1, 1]} : vector<2x8x128xf32> to vector<2x5x8xf32>
    %26 = arith.addf %24, %25 : vector<2x5x8xf32>
    %27 = vector.extract_strided_slice %9 {offsets = [0, 2, 56], sizes = [2, 5, 8], strides = [1, 1, 1]} : vector<2x8x128xf32> to vector<2x5x8xf32>
    %28 = arith.addf %26, %27 : vector<2x5x8xf32>
    %29 = vector.extract_strided_slice %9 {offsets = [0, 3, 64], sizes = [2, 5, 8], strides = [1, 1, 1]} : vector<2x8x128xf32> to vector<2x5x8xf32>
    %30 = arith.addf %28, %29 : vector<2x5x8xf32>
    %cst_10 = arith.constant 0.000000e+00 : f32
    %31 = vector.broadcast %cst_10 : f32 to vector<2x5x8xf32>
    %32 = arith.maximumf %30, %31 : vector<2x5x8xf32>
    %cst_11 = arith.constant dense<0xFF800000> : vector<2x8xf32>
    %33 = vector.multi_reduction <maximumf>, %32, %cst_11 [1] : vector<2x5x8xf32> to vector<2x8xf32>
    %34 = tpu.concatenate %15, %23, %33 in 1 : vector<2x8xf32>, vector<2x8xf32>, vector<2x8xf32> -> vector<2x24xf32>
    %cst_12 = arith.constant 0.000000e+00 : f32
    %35 = vector.broadcast %cst_12 : f32 to vector<2x104xf32>
    %36 = tpu.concatenate %34, %35 in 1 : vector<2x24xf32>, vector<2x104xf32> -> vector<2x128xf32>
    %c0_13 = arith.constant 0 : index
    %c0_14 = arith.constant 0 : index
    %37 = vector.load %arg4[%c0_13, %c0_14] : memref<2x128xf32, #tpu.memory_space<vmem>>, vector<2x128xf32>
    tpu.vector_store %arg4[%c0_13, %c0_14], %36 {strides = array<i32>} : memref<2x128xf32, #tpu.memory_space<vmem>>, vector<2x128xf32>,
    return
  }
  func.func @transform_0(%arg0: i32) -> (i32, i32, i32) {
    %c0_i32 = arith.constant 0 : i32
    %c0_i32_0 = arith.constant 0 : i32
    %c0_i32_1 = arith.constant 0 : i32
    return %arg0, %c0_i32, %c0_i32_0 : i32, i32, i32
  }
  func.func @transform_1(%arg0: i32) -> (i32, i32) {
    %c0_i32 = arith.constant 0 : i32
    %c0_i32_0 = arith.constant 0 : i32
    %c0_i32_1 = arith.constant 0 : i32
    return %c0_i32, %c0_i32_0 : i32, i32
  }
  func.func @transform_2(%arg0: i32) -> (i32, i32) {
    %c0_i32 = arith.constant 0 : i32
    %c0_i32_0 = arith.constant 0 : i32
    %c0_i32_1 = arith.constant 0 : i32
    return %c0_i32, %c0_i32_0 : i32, i32
  }
  func.func @transform_3(%arg0: i32) -> (i32, i32) {
    %c0_i32 = arith.constant 0 : i32
    %c0_i32_0 = arith.constant 0 : i32
    return %arg0, %c0_i32 : i32, i32
  }
}

</mosaic_0001>

<bundles_post_ra>
// kernel: tpu_custom_call.1
= control target key start
LH: loop header
LB: loop body
LE: loop exit
PB: predicated region body
PF: predicated region fallthrough
CT: control target
= control target key end

     0   :  { %8 = vsyncpa [#allocation3], 0  ;;  %s358_s0 = inlined_call_operand.hbm [shape: f32[2,8,16], index: 0, kind: input, shape index: {}]   ;;  %s359_s1 = inlined_call_operand.hbm [shape: bf16[16,128], index: 1, kind: input, shape index: {}]   ;;  %s360_s2 = inlined_call_operand.vmem [shape: f32[1,128], index: 2, kind: input, shape index: {}]   ;;  %s361_s3 = inlined_call_operand.hbm [shape: f32[2,128], index: 3, kind: output, shape index: {}]  }
   0x1   :  { %9 = vsyncpa [#allocation6], 0 }
   0x2   :  { %10 = vsyncpa [#allocation4], 0  ;;  %s15_s14 = sshll.u32 %s358_s0, 4  ;;  %s302_s15 = smov [#allocation2]   ;;  %s16_s14 = int_to_ptr.hbm [resolvable:$true] %s15_s14 }
   0x3   :  { %s17_s16 = sshll.u32 %s302_s15, 4  ;;  %s28_s19 = sshll.u32 %s359_s1, 4  ;;  %s18_s16 = int_to_ptr.vmem [resolvable:$true] %s17_s16  ;;  %s29_s19 = int_to_ptr.hbm [resolvable:$true] %s28_s19 }
   0x4   :  { %s303_s20 = smov 128   ;;  %s304_s21 = smov 8  }
   0x5   :  { %23 = dma.hbm_to_vmem [thread:$0]  %s16_s14, 256, %s18_s16, [#allocation3], %s303_s20, %s303_s20, %s304_s21  }
   0x6   :  { %s305_s22 = smov [#allocation5]   ;;  %s306_s24 = smov 64  }
   0x7   :  { %s30_s23 = sshll.u32 %s305_s22, 4  ;;  %s307_s25 = smov 4   ;;  %s31_s23 = int_to_ptr.vmem [resolvable:$true] %s30_s23 }
   0x8   :  { %36 = dma.hbm_to_vmem [thread:$0]  %s29_s19, 128, %s31_s23, [#allocation6], %s306_s24, %s306_s24, %s307_s25  }
   0x9   :  { %296 = dma.done.wait [#allocation3], 256  }
   0xa   :  { %297 = vsyncadd [#allocation3], 4294967040 }
   0xb   :  { %298 = dma.done.wait [#allocation6], 128  }
   0xc   :  { %299 = vsyncadd [#allocation6], 4294967168  ;;  %v212_v0 = vld [vmem:[#allocation5] sm:$0xff]  ;;  %v48_v1 = vld [vmem:[#allocation2] sm:$0xff]  ;;  %vm59_vm0 = vcmask 130048   ;;  %s308_s26 = smov 104  }
   0xd   :  { %v49_v2 = vld [vmem:[#allocation2 + $0x8] sm:$0xff]  ;;  %70 = vmatpush.bf16.msra.mxu0 %v212_v0  ;;  %v223_v4 = vld [vmem:[%s360_s2] ss:$0 sm:$0xff]  ;;  %s309_s27 = smov 112   ;;  %s310_s28 = smov 120   ;;  %vm97_vm1 = vcmask 63488  }
   0xe   :  { %v50_v3 = vpack.c.bf16 %v49_v2, %v48_v1  ;;  %vm124_vm2 = vcmask 193664   ;;  %vm151_vm3 = vcmask 389440   ;;  %vm168_vm4 = vcmask 1041409   ;;  %s311_s2 = smov [#allocation7]   ;;  %s196_s5 = sshll.u32 %s361_s3, 4  ;;  %s197_s5 = int_to_ptr.hbm [resolvable:$true] %s196_s5 }
   0xf   :  { %vm183_vm5 = vcmask 64512   ;;  %s194_s29 = sshll.u32 %s311_s2, 4  ;;  %vm186_vm6 = vcmask 195584   ;;  %s195_s29 = int_to_ptr.vmem [resolvable:$true] %s194_s29 }
  0x10   :  { %211 = vmatmul.msk.bf16.vlgmr.msra.gmra.mxu0 %vm59_vm0, %v50_v3 }
  0x8d   :  { %v72_v5 = vpop.f32.mrf.mxu0 }
  0x8e   :  { %v81_v6 = vadd.f32 %v223_v4, %v72_v5 }
  0x90   :  { %v139_v7 = vrot.slane %v81_v6, 3  ;;  %v112_v8 = vrot.slane %v81_v6, 2  ;;  %v85_v9 = vrot.slane %v81_v6, 1 }
  0x92   :  { %141 = vrot.lane.b32.xlu2 %v139_v7, %s308_s26  ;;  %114 = vrot.lane.b32.xlu1 %v112_v8, %s309_s27 }
  0x93   :  { %87 = vrot.lane.b32.xlu0 %v85_v9, %s310_s28 }
  0x95   :  { %v74_v10 = vpop.f32.mrf.mxu0 }
  0x96   :  { %v82_v11 = vadd.f32 %v223_v4, %v74_v10 }
  0x98   :  { %v140_v12 = vrot.slane %v82_v11, 3  ;;  %v113_v13 = vrot.slane %v82_v11, 2  ;;  %v86_v14 = vrot.slane %v82_v11, 1 }
  0x9a   :  { %143 = vrot.lane.b32.xlu2 %v140_v12, %s308_s26  ;;  %116 = vrot.lane.b32.xlu1 %v113_v13, %s309_s27 }
  0x9b   :  { %89 = vrot.lane.b32.xlu0 %v86_v14, %s310_s28 }
  0xec   :  { %v142_v18 = vpop.permute.xlu2 %141 }
  0xf4   :  { %v144_v38 = vpop.permute.xlu2 %143 }
 0x104   :  { %v115_v15 = vpop.permute.xlu1 %114 }
 0x105   :  { %v88_v16 = vpop.permute.xlu0 %87 }
 0x106   :  { %v93_v17 = vadd.f32 %v88_v16, %v81_v6 }
 0x108   :  { %v95_v19 = vmax.f32 %v93_v17, 0.0  ;;  %v120_v20 = vadd.f32 %v115_v15, %v93_v17 }
 0x10a   :  { %v98_v21 = vsel %vm97_vm1, %v95_v19, -inf  ;;  %v122_v22 = vmax.f32 %v120_v20, 0.0  ;;  %v147_v23 = vadd.f32 %v142_v18, %v120_v20 }
 0x10b   :  { %v99_v24 = vrot.slane %v98_v21, 4 }
 0x10c   :  { %v125_v25 = vsel %vm124_vm2, %v122_v22, -inf  ;;  %v149_v26 = vmax.f32 %v147_v23, 0.0  ;;  %v117_v34 = vpop.permute.xlu1 %116 }
 0x10d   :  { %v100_v27 = vmax.f32 %v98_v21, %v99_v24  ;;  %v126_v28 = vrot.slane %v125_v25, 4  ;;  %v90_v29 = vpop.permute.xlu0 %89 }
 0x10e   :  { %v152_v30 = vsel %vm151_vm3, %v149_v26, -inf  ;;  %v94_v31 = vadd.f32 %v90_v29, %v82_v11 }
 0x10f   :  { %v127_v32 = vmax.f32 %v125_v25, %v126_v28  ;;  %v153_v33 = vrot.slane %v152_v30, 4  ;;  %v101_v35 = vrot.slane %v100_v27, 2 }
 0x110   :  { %v96_v36 = vmax.f32 %v94_v31, 0.0  ;;  %v121_v37 = vadd.f32 %v117_v34, %v94_v31 }
 0x111   :  { %v154_v39 = vmax.f32 %v152_v30, %v153_v33  ;;  %v128_v43 = vrot.slane %v127_v32, 2  ;;  %v102_v45 = vmax.f32 %v100_v27, %v101_v35 }
 0x112   :  { %v105_v40 = vsel %vm97_vm1, %v96_v36, -inf  ;;  %v123_v41 = vmax.f32 %v121_v37, 0.0  ;;  %v148_v42 = vadd.f32 %v144_v38, %v121_v37 }
 0x113   :  { %v106_v44 = vrot.slane %v105_v40, 4  ;;  %v155_v48 = vrot.slane %v154_v39, 2  ;;  %v129_v55 = vmax.f32 %v127_v32, %v128_v43  ;;  %v103_v56 = vrot.slane %v102_v45, 1 }
 0x114   :  { %v132_v46 = vsel %vm124_vm2, %v123_v41, -inf  ;;  %v150_v47 = vmax.f32 %v148_v42, 0.0 }
 0x115   :  { %v107_v49 = vmax.f32 %v105_v40, %v106_v44  ;;  %v133_v50 = vrot.slane %v132_v46, 4  ;;  %v156_v60 = vmax.f32 %v154_v39, %v155_v48  ;;  %v130_v63 = vrot.slane %v129_v55, 1 }
 0x116   :  { %v159_v51 = vsel %vm151_vm3, %v150_v47, -inf  ;;  %v104_v1 = vmax.f32 %v102_v45, %v103_v56 }
 0x117   :  { %v108_v52 = vrot.slane %v107_v49, 2  ;;  %v134_v53 = vmax.f32 %v132_v46, %v133_v50  ;;  %v160_v54 = vrot.slane %v159_v51, 4  ;;  %v157_v3 = vrot.slane %v156_v60, 1 }
 0x118   :  { %v131_v6 = vmax.f32 %v129_v55, %v130_v63 }
 0x119   :  { %v109_v57 = vmax.f32 %v107_v49, %v108_v52  ;;  %v135_v58 = vrot.slane %v134_v53, 2  ;;  %v161_v59 = vmax.f32 %v159_v51, %v160_v54  ;;  %v158_v11 = vmax.f32 %v156_v60, %v157_v3 }
 0x11b   :  { %v110_v61 = vrot.slane %v109_v57, 1  ;;  %v162_v62 = vrot.slane %v161_v59, 2  ;;  %v136_v0 = vmax.f32 %v134_v53, %v135_v58 }
 0x11d   :  { %v137_v2 = vrot.slane %v136_v0, 1  ;;  %v163_v4 = vmax.f32 %v161_v59, %v162_v62  ;;  %v111_v5 = vmax.f32 %v109_v57, %v110_v61 }
 0x11f   :  { %v138_v7 = vmax.f32 %v136_v0, %v137_v2  ;;  %v164_v8 = vrot.slane %v163_v4, 1  ;;  %v169_v9 = vsel %vm168_vm4, %v111_v5, %v104_v1 }
 0x121   :  { %v173_v10 = vsel %vm168_vm4, %v138_v7, %v131_v6  ;;  %v165_v12 = vmax.f32 %v163_v4, %v164_v8 }
 0x122   :  { %174 = vrot.lane.b32.xlu0 %v173_v10, %s310_s28 }
 0x123   :  { %v179_v13 = vsel %vm168_vm4, %v165_v12, %v158_v11 }
 0x124   :  { %180 = vrot.lane.b32.xlu1 %v179_v13, %s308_s26 }
 0x194   :  { %v175_v14 = vpop.permute.xlu0 %174 }
 0x195   :  { %v184_v15 = vsel %vm183_vm5, %v169_v9, %v175_v14 }
 0x196   :  { %v181_v16 = vpop.permute.xlu1 %180 }
 0x197   :  { %v185_v17 = vsel %vm59_vm0, %v184_v15, %v181_v16 }
 0x198   :  { %v187_v18 = vsel %vm186_vm6, %v185_v17, 0.0 }
 0x199   :  { %188 = vst [vmem:[#allocation7] sm:$0x3] %v187_v18 }
 0x19a   :  { %199 = dma.vmem_to_hbm [thread:$0]  %s195_s29, 32, %s197_s5, [#allocation4]  }
 0x19b   :  { %300 = dma.done.wait [#allocation4], 32  }
 0x19c   :  { %301 = vsyncadd [#allocation4], 4294967264 }
 0x19d   :  { %204 = vsyncpa [#allocation3], 1 }
 0x19e   :  { %205 = vsyncpa [#allocation6], 1 }
 0x19f   :  { %206 = vsyncpa [#allocation4], 1 }

</bundles_post_ra>
